<compile_context>
chip_gen: v5e
topology: v5e:2x2
jax: 0.10.0
libtpu: 0.0.40
codegen_flags: <defaults>
</compile_context>

<pallas_src>
import functools

import jax
import jax.numpy as jnp
from jax.experimental import pallas as pl
from jax.experimental.pallas import tpu as pltpu


def _round_up(v, m):
    return (v + m - 1) // m * m


def _query_vmem_capacity():
    """Physical VMEM of the local TPU generation; conservative 64 MiB fallback."""
    try:
        cap = int(getattr(pltpu.get_tpu_info(), "vmem_capacity_bytes", 0))
        if cap > 0:
            return cap
    except Exception:
        pass
    return 64 * 1024 * 1024


_VMEM_CAP_BYTES = _query_vmem_capacity()


def _pick_row_tile(np_rows, row_bytes, budget):
    """Largest row tile (multiple of 128, divides np_rows) whose streamed
    (double-buffered adj + out) footprint fits `budget`.  np_rows is always a
    multiple of 128, so the 128 fallback always divides."""
    if np_rows <= 1024 and np_rows * row_bytes <= budget:
        return np_rows
    for cand in (1024, 512, 256, 128):
        if np_rows % cand == 0 and cand * row_bytes <= budget:
            return cand
    return 128


def gcn_kernel(x_ref, adj_ref, w_ref, b_ref, o_ref, *, tn):
    # x_ref:   (1, Np, Dp)   full per-batch features (VMEM-resident per batch)
    # adj_ref: (1, TN, Np)   streamed row tile of the row-normalized adjacency
    # w_ref:   (2*Dp, Hp)    stacked [W_self; W_agg] (resident)
    # b_ref:   (1, Hp)       f32 bias (resident)
    # o_ref:   (1, TN, Hp)   f32 output tile
    r = pl.program_id(1)
    row_start = pl.multiple_of(r * tn, tn)

    x_full = x_ref[0]                                  # (Np, Dp)
    adj = adj_ref[0]                                   # (TN, Np)
    x_row = x_ref[0, pl.ds(row_start, tn), :]          # (TN, Dp) aligned slice, no extra stream

    # Mean aggregation for this row tile (adj already carries 1/deg).
    agg = jnp.dot(adj, x_full, preferred_element_type=jnp.float32)      # (TN, Dp) f32

    # Projection of [x, agg] by the stacked W as ONE matmul (K = 2*Dp, 128-aligned concat).
    cat = jnp.concatenate([x_row, agg.astype(x_row.dtype)], axis=-1)    # (TN, 2*Dp)
    out = jnp.dot(cat, w_ref[...], preferred_element_type=jnp.float32)  # (TN, Hp) f32

    # Bias + ReLU (f32), lane-dense unmasked store.
    out = jnp.maximum(out + b_ref[...], 0.0)
    o_ref[0] = out.astype(o_ref.dtype)


@functools.partial(jax.jit, static_argnames=("compute_dtype",))
def gcn_forward(x, adj, weight, bias, *, compute_dtype=jnp.bfloat16):
    """x: (B, N, D), adj: (B, N, N), weight: (2D, H), bias: (H,).  Returns (B, N, H) f32.

    compute_dtype controls the streaming dtype of x/adj/W (default bf16, ~2x less
    HBM traffic on the dominant adjacency stream); accumulation stays f32.
    """
    B, N, D = x.shape
    two_d, H = weight.shape
    assert two_d == 2 * D

    # Lanes (last dims) padded to 128; node rows padded to 128 so the row tile
    # never collapses below 128 and the adj contraction dim stays MXU-friendly.
    Dp = _round_up(max(D, 1), 128)
    Hp = _round_up(max(H, 1), 128)
    Np = _round_up(max(N, 1), 128)

    cdt = jnp.dtype(compute_dtype if compute_dtype is not None else x.dtype)
    item = cdt.itemsize

    # Zero-pad; padding contributes zeros everywhere and is sliced off below.
    xp = jnp.pad(x, ((0, 0), (0, Np - N), (0, Dp - D))).astype(cdt)
    adjp = jnp.pad(adj, ((0, 0), (0, Np - N), (0, Np - N))).astype(cdt)
    w_self = jnp.pad(weight[:D], ((0, Dp - D), (0, Hp - H)))
    w_agg = jnp.pad(weight[D:], ((0, Dp - D), (0, Hp - H)))
    w_stacked = jnp.concatenate([w_self, w_agg], axis=0).astype(cdt)   # (2*Dp, Hp)
    b2d = jnp.pad(bias, (0, Hp - H)).astype(jnp.float32).reshape(1, Hp)

    # --- Generation-aware tiling / VMEM sizing ------------------------------
    # Resident operands (the default pipeliner double-buffers them too).
    resident = (2 * Np * Dp * item          # full x per batch
                + 2 * (2 * Dp) * Hp * item  # stacked weights
                + 2 * Hp * 4)               # bias (f32)
    # Streamed bytes per output row (double-buffered): adj row + f32 out row.
    row_bytes = 2 * (Np * item + Hp * 4)
    stream_budget = max(int(0.6 * _VMEM_CAP_BYTES) - resident, 128 * row_bytes)
    tn = _pick_row_tile(Np, row_bytes, stream_budget)
    grid = (B, Np // tn)

    est = resident + tn * row_bytes
    vmem_limit = int(min(max(int(1.5 * est) + (8 << 20), 32 << 20),
                         int(0.8 * _VMEM_CAP_BYTES)))

    out = pl.pallas_call(
        functools.partial(gcn_kernel, tn=tn),
        out_shape=jax.ShapeDtypeStruct((B, Np, Hp), jnp.float32),
        grid_spec=pltpu.PrefetchScalarGridSpec(
            num_scalar_prefetch=0,
            grid=grid,
            in_specs=[
                pl.BlockSpec((1, Np, Dp), lambda b, r: (b, 0, 0)),   # x, full (resident per batch)
                pl.BlockSpec((1, tn, Np), lambda b, r: (b, r, 0)),   # adj row tile (streamed)
                pl.BlockSpec((2 * Dp, Hp), lambda b, r: (0, 0)),     # stacked W (resident)
                pl.BlockSpec((1, Hp), lambda b, r: (0, 0)),          # bias (resident)
            ],
            out_specs=pl.BlockSpec((1, tn, Hp), lambda b, r: (b, r, 0)),
        ),
        compiler_params=pltpu.CompilerParams(
            dimension_semantics=("parallel", "parallel"),
            vmem_limit_bytes=vmem_limit,
        ),
    )(xp, adjp, w_stacked, b2d)

    return out[:, :N, :H]


def reference_forward(x, adj, weight, bias):
    agg = jnp.einsum('bnm,bmd->bnd', adj, x)
    cat = jnp.concatenate([x, agg], axis=-1)
    out = jnp.einsum('bnd,df->bnf', cat, weight) + bias
    return jnp.maximum(out, 0.0)


if __name__ == "__main__":
    B, N, D, H = 2, 16, 8, 32   # batch, nodes, feature_dim, nhid

    key = jax.random.PRNGKey(0)
    kx, kadj, kw = jax.random.split(key, 3)

    x = jax.random.normal(kx, (B, N, D), dtype=jnp.float32)

    # Row-normalized adjacency (mean aggregator semantics), with self-loops.
    raw_adj = (jax.random.uniform(kadj, (B, N, N)) > 0.5).astype(jnp.float32)
    raw_adj = raw_adj + jnp.eye(N)[None]
    adj = raw_adj / jnp.sum(raw_adj, axis=-1, keepdims=True)

    # Deterministic xavier-uniform weight init, zero bias (as in GraphConv.__init__).
    fan_in, fan_out = 2 * D, H
    limit = (6.0 / (fan_in + fan_out)) ** 0.5
    weight = jax.random.uniform(kw, (2 * D, H), minval=-limit, maxval=limit,
                                dtype=jnp.float32)
    bias = jnp.zeros((H,), dtype=jnp.float32)

    ref = reference_forward(x, adj, weight, bias)

    # Exact path (f32 streaming): tight tolerance validates the kernel algebra.
    out_f32 = gcn_forward(x, adj, weight, bias, compute_dtype=jnp.float32)
    jax.block_until_ready(out_f32)
    assert out_f32.shape == (B, N, H)
    assert jnp.allclose(out_f32, ref, atol=1e-5, rtol=1e-5), "f32 mismatch vs reference"

    # Default fast path (bf16 adjacency/feature streaming, f32 accumulation).
    out_bf16 = gcn_forward(x, adj, weight, bias)
    jax.block_until_ready(out_bf16)
    assert out_bf16.shape == (B, N, H)
    assert jnp.allclose(out_bf16, ref, atol=5e-2, rtol=5e-2), "bf16 mismatch vs reference"

    print("KERNEL_OK")
</pallas_src>

<mosaic_0001>
module attributes {stable_mosaic.version = 11 : i64} {
  func.func @gcn_kernel(%arg0: i32, %arg1: i32, %arg2: memref<1x128x128xf32, #tpu.memory_space<vmem>>, %arg3: memref<1x128x128xf32, #tpu.memory_space<vmem>>, %arg4: memref<256x128xf32, #tpu.memory_space<vmem>>, %arg5: memref<1x128xf32, #tpu.memory_space<vmem>>, %arg6: memref<1x128x128xf32, #tpu.memory_space<vmem>>) attributes {dimension_semantics = [#tpu.dimension_semantics<parallel>, #tpu.dimension_semantics<parallel>], iteration_bounds = array<i64: 2, 1>, scalar_prefetch = 0 : i64, scratch_operands = 0 : i64, tpu.core_type = #tpu.core_type<tc>, window_params = [{transform_indices = @transform_0, window_bounds = array<i64: 1, 128, 128>}, {transform_indices = @transform_1, window_bounds = array<i64: 1, 128, 128>}, {pipeline_mode = #tpu.pipeline_mode<synchronous>, transform_indices = @transform_2, window_bounds = array<i64: 256, 128>}, {pipeline_mode = #tpu.pipeline_mode<synchronous>, transform_indices = @transform_3, window_bounds = array<i64: 1, 128>}, {transform_indices = @transform_4, window_bounds = array<i64: 1, 128, 128>}]} {
    %c128_i32 = arith.constant 128 : i32
    %0 = arith.muli %arg1, %c128_i32 : i32
    %1 = tpu.assume_multiple %0, 128 : i32
    %c0 = arith.constant 0 : index
    %c0_0 = arith.constant 0 : index
    %c0_1 = arith.constant 0 : index
    %2 = vector.load %arg2[%c0, %c0_0, %c0_1] : memref<1x128x128xf32, #tpu.memory_space<vmem>>, vector<1x128x128xf32>
    %3 = vector.shape_cast %2 : vector<1x128x128xf32> to vector<128x128xf32>
    %c0_2 = arith.constant 0 : index
    %c0_3 = arith.constant 0 : index
    %c0_4 = arith.constant 0 : index
    %4 = vector.load %arg3[%c0_2, %c0_3, %c0_4] : memref<1x128x128xf32, #tpu.memory_space<vmem>>, vector<1x128x128xf32>
    %5 = vector.shape_cast %4 : vector<1x128x128xf32> to vector<128x128xf32>
    %c0_5 = arith.constant 0 : index
    %6 = arith.index_cast %1 : i32 to index
    %c0_6 = arith.constant 0 : index
    %7 = vector.load %arg2[%c0_5, %6, %c0_6] : memref<1x128x128xf32, #tpu.memory_space<vmem>>, vector<1x128x128xf32>
    %8 = vector.shape_cast %7 : vector<1x128x128xf32> to vector<128x128xf32>
    %cst = arith.constant dense<0.000000e+00> : vector<128x128xf32>
    %9 = tpu.matmul %5, %3, %cst {dimension_numbers = #tpu.dot_dimension_numbers<[1], [0], [0], [1], [0, 0, 1, 1], [], []>} : vector<128x128xf32>, vector<128x128xf32>, vector<128x128xf32> -> vector<128x128xf32>
    %10 = tpu.concatenate %8, %9 in 1 : vector<128x128xf32>, vector<128x128xf32> -> vector<128x256xf32>
    %c0_7 = arith.constant 0 : index
    %c0_8 = arith.constant 0 : index
    %11 = vector.load %arg4[%c0_7, %c0_8] : memref<256x128xf32, #tpu.memory_space<vmem>>, vector<256x128xf32>
    %cst_9 = arith.constant dense<0.000000e+00> : vector<128x128xf32>
    %12 = tpu.matmul %10, %11, %cst_9 {dimension_numbers = #tpu.dot_dimension_numbers<[1], [0], [0], [1], [0, 0, 1, 1], [], []>} : vector<128x256xf32>, vector<256x128xf32>, vector<128x128xf32> -> vector<128x128xf32>
    %c0_10 = arith.constant 0 : index
    %c0_11 = arith.constant 0 : index
    %13 = vector.load %arg5[%c0_10, %c0_11] : memref<1x128xf32, #tpu.memory_space<vmem>>, vector<1x128xf32>
    %14 = vector.broadcast %13 : vector<1x128xf32> to vector<128x128xf32>
    %15 = arith.addf %12, %14 : vector<128x128xf32>
    %cst_12 = arith.constant 0.000000e+00 : f32
    %16 = vector.broadcast %cst_12 : f32 to vector<128x128xf32>
    %17 = arith.maximumf %15, %16 : vector<128x128xf32>
    %c0_13 = arith.constant 0 : index
    %c0_14 = arith.constant 0 : index
    %c0_15 = arith.constant 0 : index
    %18 = vector.load %arg6[%c0_13, %c0_14, %c0_15] : memref<1x128x128xf32, #tpu.memory_space<vmem>>, vector<1x128x128xf32>
    %19 = vector.shape_cast %18 : vector<1x128x128xf32> to vector<128x128xf32>
    %20 = vector.shape_cast %17 : vector<128x128xf32> to vector<1x128x128xf32>
    tpu.vector_store %arg6[%c0_13, %c0_14, %c0_15], %20 {strides = array<i32>} : memref<1x128x128xf32, #tpu.memory_space<vmem>>, vector<1x128x128xf32>,
    return
  }
  func.func @transform_0(%arg0: i32, %arg1: i32) -> (i32, i32, i32) {
    %c0_i32 = arith.constant 0 : i32
    %c0_i32_0 = arith.constant 0 : i32
    %c0_i32_1 = arith.constant 0 : i32
    return %arg0, %c0_i32, %c0_i32_0 : i32, i32, i32
  }
  func.func @transform_1(%arg0: i32, %arg1: i32) -> (i32, i32, i32) {
    %c0_i32 = arith.constant 0 : i32
    %c0_i32_0 = arith.constant 0 : i32
    return %arg0, %arg1, %c0_i32 : i32, i32, i32
  }
  func.func @transform_2(%arg0: i32, %arg1: i32) -> (i32, i32) {
    %c0_i32 = arith.constant 0 : i32
    %c0_i32_0 = arith.constant 0 : i32
    %c0_i32_1 = arith.constant 0 : i32
    return %c0_i32, %c0_i32_0 : i32, i32
  }
  func.func @transform_3(%arg0: i32, %arg1: i32) -> (i32, i32) {
    %c0_i32 = arith.constant 0 : i32
    %c0_i32_0 = arith.constant 0 : i32
    %c0_i32_1 = arith.constant 0 : i32
    return %c0_i32, %c0_i32_0 : i32, i32
  }
  func.func @transform_4(%arg0: i32, %arg1: i32) -> (i32, i32, i32) {
    %c0_i32 = arith.constant 0 : i32
    %c0_i32_0 = arith.constant 0 : i32
    return %arg0, %arg1, %c0_i32 : i32, i32, i32
  }
}

</mosaic_0001>

<bundles_post_ra>
// kernel: gcn_forward.1
= control target key start
LH: loop header
LB: loop body
LE: loop exit
PB: predicated region body
PF: predicated region fallthrough
CT: control target
= control target key end

     0   :  { %s809_s15 = smov 0   ;;  %s811_s16 = smov 0   ;;  %s1133_s0 = inlined_call_operand.vmem [shape: f32[2,128,128], index: 0, kind: input, shape index: {}]   ;;  %s1134_s1 = inlined_call_operand.vmem [shape: f32[2,128,128], index: 1, kind: input, shape index: {}]   ;;  %s1135_s2 = inlined_call_operand.vmem [shape: f32[256,128], index: 2, kind: input, shape index: {}]   ;;  %s1136_s3 = inlined_call_operand.vmem [shape: f32[1,128], index: 3, kind: input, shape index: {}]   ;;  %s1137_s4 = inlined_call_operand.vmem [shape: f32[2,128,128], index: 4, kind: output, shape index: {}]  }
   0x1   :  { %s813_s17 = smov 0  }
   0x2 LB: > { %s26_s18 = sadd.s32 1, %s778_s16  ;;  %p675_p0 = scmp.ge.s32.totalorder %s782_s17, 1  ;;  %s782_s17 = sphi %s813_s17, %s14_s17   ;;  %s778_s16 = sphi %s811_s16, %s1139_s16   ;;  %s774_s15 = sphi %s809_s15, %s1138_s15  }
   0x3   : > { %p28_p1 = scmp.ge.s32.totalorder %s26_s18, 2  ;;  %p193_p2 = scmp.lt.s32.totalorder %s782_s17, 3 }
   0x5   : > { %s1141_s18 = smov (%p28_p1, %s26_s18), 0  ;;  %p194_p3 = pnand %p675_p0, %p193_p2 }
   0x6   : > { %p232_p4 = scmp.lt.s32.totalorder (!%p194_p3), %s774_s15, 1 }
   0x7   : > { %197 = sbr.rel (%p194_p3) target bundleno = 398 (0x18e), region = 36 }
   0xc   : > { %s1143_s15 = smov (!%p232_p4, %s774_s15), 1  ;;  %v936_v28 = vld [vmem:[%s1135_s2 + $0xf8] sm:$0xff]  ;;  %v944_v30 = vld [vmem:[%s1135_s2 + $0xf0] sm:$0xff]  ;;  %v953_v32 = vld [vmem:[%s1135_s2 + $0xe8] sm:$0xff] }
   0xd   : > { %s827_s19 = sshll.u32 %s1143_s15, 7  ;;  %v387_v29 = vld [vmem:[%s1135_s2 + $0x78] sm:$0xff]  ;;  %473 = vmatpush.msra.mxu2 %v936_v28  ;;  %v386_v31 = vld [vmem:[%s1135_s2 + $0x70] sm:$0xff]  ;;  %v385_v33 = vld [vmem:[%s1135_s2 + $0x68] sm:$0xff] }
   0xe   : > { %s833_s22 = scalar_lea.vmem %s1133_s0, %s827_s19  ;;  %s910_s25 = scalar_lea.vmem %s1134_s1, %s827_s19  ;;  %408 = vmatpush.msra.mxu1 %v387_v29  ;;  %v962_v34 = vld [vmem:[%s1135_s2 + $0xe0] sm:$0xff]  ;;  %v972_v37 = vld [vmem:[%s1135_s2 + $0xd8] sm:$0xff]  ;;  %v981_v39 = vld [vmem:[%s1135_s2 + $0xd0] sm:$0xff] }
   0xf   : > { %v836_v0 = vld [vmem:[%s833_s22 + $0x78] sm:$0xff]  ;;  %v839_v1 = vld [vmem:[%s833_s22 + $0x70] sm:$0xff]  ;;  %v844_v2 = vld [vmem:[%s833_s22 + $0x68] sm:$0xff]  ;;  %474 = vmatpush.msra.mxu2 %v944_v30  ;;  %s1091_s30 = scalar_lea.vmem %s1137_s4, %s827_s19 }
  0x10   : > { %307 = vmatpush.msra.mxu0 %v836_v0  ;;  %687 = vmatpush.msra.mxu3 %v836_v0  ;;  %v849_v3 = vld [vmem:[%s833_s22 + $0x60] sm:$0xff]  ;;  %v854_v4 = vld [vmem:[%s833_s22 + $0x58] sm:$0xff]  ;;  %v859_v5 = vld [vmem:[%s833_s22 + $0x50] sm:$0xff] }
  0x11   : > { %v864_v6 = vld [vmem:[%s833_s22 + $0x48] sm:$0xff]  ;;  %v869_v7 = vld [vmem:[%s833_s22 + $0x40] sm:$0xff]  ;;  %v874_v8 = vld [vmem:[%s833_s22 + $0x38] sm:$0xff]  ;;  %409 = vmatpush.msra.mxu1 %v386_v31  ;;  %475 = vmatpush.msra.mxu2 %v953_v32 }
  0x12   : > { %308 = vmatpush.msra.mxu0 %v839_v1  ;;  %688 = vmatpush.msra.mxu3 %v839_v1  ;;  %v879_v9 = vld [vmem:[%s833_s22 + $0x30] sm:$0xff]  ;;  %v884_v10 = vld [vmem:[%s833_s22 + $0x28] sm:$0xff]  ;;  %v889_v11 = vld [vmem:[%s833_s22 + $0x20] sm:$0xff] }
  0x13   : > { %v894_v12 = vld [vmem:[%s833_s22 + $0x18] sm:$0xff]  ;;  %v899_v13 = vld [vmem:[%s833_s22 + $0x10] sm:$0xff]  ;;  %v904_v14 = vld [vmem:[%s833_s22 + $0x8] sm:$0xff]  ;;  %410 = vmatpush.msra.mxu1 %v385_v33  ;;  %476 = vmatpush.msra.mxu2 %v962_v34 }
  0x14   : > { %309 = vmatpush.msra.mxu0 %v844_v2  ;;  %689 = vmatpush.msra.mxu3 %v844_v2  ;;  %v915_v15 = vld [vmem:[%s833_s22] sm:$0xff]  ;;  %v275_v18 = vld [vmem:[%s910_s25 + $0x8] sm:$0xff]  ;;  %v276_v20 = vld [vmem:[%s910_s25 + $0x10] sm:$0xff] }
  0x15   : > { %v274_v16 = vld [vmem:[%s910_s25] sm:$0xff]  ;;  %v287_v19 = vld [vmem:[%s910_s25 + $0x68] sm:$0xff]  ;;  %v288_v21 = vld [vmem:[%s910_s25 + $0x70] sm:$0xff]  ;;  %477 = vmatpush.msra.mxu2 %v972_v37 }
  0x16   : > { %310 = vmatpush.msra.mxu0 %v849_v3  ;;  %690 = vmatpush.msra.mxu3 %v849_v3  ;;  %v286_v17 = vld [vmem:[%s910_s25 + $0x60] sm:$0xff]  ;;  %v277_v22 = vld [vmem:[%s910_s25 + $0x18] sm:$0xff]  ;;  %v279_v25 = vld [vmem:[%s910_s25 + $0x28] sm:$0xff] }
  0x17   : > { %v289_v23 = vld [vmem:[%s910_s25 + $0x78] sm:$0xff]  ;;  %v278_v24 = vld [vmem:[%s910_s25 + $0x20] sm:$0xff]  ;;  %v280_v26 = vld [vmem:[%s910_s25 + $0x30] sm:$0xff]  ;;  %478 = vmatpush.msra.mxu2 %v981_v39 }
  0x18   : > { %311 = vmatpush.msra.mxu0 %v854_v4  ;;  %691 = vmatpush.msra.mxu3 %v854_v4  ;;  %v281_v27 = vld [vmem:[%s910_s25 + $0x38] sm:$0xff]  ;;  %v384_v35 = vld [vmem:[%s1135_s2 + $0x60] sm:$0xff]  ;;  %v382_v40 = vld [vmem:[%s1135_s2 + $0x50] sm:$0xff] }
  0x19   : > { %v282_v36 = vld [vmem:[%s910_s25 + $0x40] sm:$0xff]  ;;  %v383_v38 = vld [vmem:[%s1135_s2 + $0x58] sm:$0xff]  ;;  %411 = vmatpush.msra.mxu1 %v384_v35  ;;  %v990_v41 = vld [vmem:[%s1135_s2 + $0xc8] sm:$0xff] }
  0x1a   : > { %312 = vmatpush.msra.mxu0 %v859_v5  ;;  %692 = vmatpush.msra.mxu3 %v859_v5  ;;  %v381_v42 = vld [vmem:[%s1135_s2 + $0x48] sm:$0xff]  ;;  %v999_v43 = vld [vmem:[%s1135_s2 + $0xc0] sm:$0xff]  ;;  %v395_v46 = vld [vmem:[%s1135_s2 + $0xb8] sm:$0xff] }
  0x1b   : > { %412 = vmatpush.msra.mxu1 %v383_v38  ;;  %v380_v44 = vld [vmem:[%s1135_s2 + $0x40] sm:$0xff]  ;;  %v283_v45 = vld [vmem:[%s910_s25 + $0x48] sm:$0xff]  ;;  %479 = vmatpush.msra.mxu2 %v990_v41  ;;  %v379_v47 = vld [vmem:[%s1135_s2 + $0x38] sm:$0xff] }
  0x1c   : > { %313 = vmatpush.msra.mxu0 %v864_v6  ;;  %693 = vmatpush.msra.mxu3 %v864_v6  ;;  %v394_v48 = vld [vmem:[%s1135_s2 + $0xb0] sm:$0xff]  ;;  %v393_v50 = vld [vmem:[%s1135_s2 + $0xa8] sm:$0xff]  ;;  %v392_v52 = vld [vmem:[%s1135_s2 + $0xa0] sm:$0xff] }
  0x1d   : > { %413 = vmatpush.msra.mxu1 %v382_v40  ;;  %480 = vmatpush.msra.mxu2 %v999_v43  ;;  %v378_v49 = vld [vmem:[%s1135_s2 + $0x30] sm:$0xff]  ;;  %v377_v51 = vld [vmem:[%s1135_s2 + $0x28] sm:$0xff]  ;;  %v376_v53 = vld [vmem:[%s1135_s2 + $0x20] sm:$0xff] }
  0x1e   : > { %314 = vmatpush.msra.mxu0 %v869_v7  ;;  %694 = vmatpush.msra.mxu3 %v869_v7  ;;  %v284_v54 = vld [vmem:[%s910_s25 + $0x50] sm:$0xff]  ;;  %v391_v55 = vld [vmem:[%s1135_s2 + $0x98] sm:$0xff]  ;;  %v389_v59 = vld [vmem:[%s1135_s2 + $0x88] sm:$0xff] }
  0x1f   : > { %414 = vmatpush.msra.mxu1 %v381_v42  ;;  %481 = vmatpush.msra.mxu2 %v395_v46  ;;  %v375_v56 = vld [vmem:[%s1135_s2 + $0x18] sm:$0xff]  ;;  %v390_v57 = vld [vmem:[%s1135_s2 + $0x90] sm:$0xff]  ;;  %v373_v61 = vld [vmem:[%s1135_s2 + $0x8] sm:$0xff] }
  0x20   : > { %315 = vmatpush.msra.mxu0 %v874_v8  ;;  %695 = vmatpush.msra.mxu3 %v874_v8  ;;  %v374_v58 = vld [vmem:[%s1135_s2 + $0x10] sm:$0xff]  ;;  %v285_v60 = vld [vmem:[%s910_s25 + $0x58] sm:$0xff]  ;;  %v388_v62 = vld [vmem:[%s1135_s2 + $0x80] sm:$0xff] }
  0x21   : > { %415 = vmatpush.msra.mxu1 %v380_v44  ;;  %482 = vmatpush.msra.mxu2 %v394_v48  ;;  %v372_v63 = vld [vmem:[%s1135_s2] sm:$0xff] }
  0x22   : > { %316 = vmatpush.msra.mxu0 %v879_v9  ;;  %696 = vmatpush.msra.mxu3 %v879_v9 }
  0x23   : > { %416 = vmatpush.msra.mxu1 %v379_v47  ;;  %483 = vmatpush.msra.mxu2 %v393_v50 }
  0x24   : > { %317 = vmatpush.msra.mxu0 %v884_v10  ;;  %697 = vmatpush.msra.mxu3 %v884_v10 }
  0x25   : > { %417 = vmatpush.msra.mxu1 %v378_v49  ;;  %484 = vmatpush.msra.mxu2 %v392_v52 }
  0x26   : > { %318 = vmatpush.msra.mxu0 %v889_v11  ;;  %698 = vmatpush.msra.mxu3 %v889_v11 }
  0x27   : > { %418 = vmatpush.msra.mxu1 %v377_v51  ;;  %485 = vmatpush.msra.mxu2 %v391_v55 }
  0x28   : > { %319 = vmatpush.msra.mxu0 %v894_v12  ;;  %699 = vmatpush.msra.mxu3 %v894_v12 }
  0x29   : > { %419 = vmatpush.msra.mxu1 %v376_v53  ;;  %486 = vmatpush.msra.mxu2 %v390_v57 }
  0x2a   : > { %320 = vmatpush.msra.mxu0 %v899_v13  ;;  %700 = vmatpush.msra.mxu3 %v899_v13 }
  0x2b   : > { %420 = vmatpush.msra.mxu1 %v375_v56  ;;  %487 = vmatpush.msra.mxu2 %v389_v59 }
  0x2c   : > { %321 = vmatpush.msra.mxu0 %v904_v14  ;;  %701 = vmatpush.msra.mxu3 %v904_v14 }
  0x2d   : > { %421 = vmatpush.msra.mxu1 %v374_v58  ;;  %488 = vmatpush.msra.mxu2 %v388_v62 }
  0x2e   : > { %322 = vmatpush.msra.mxu0 %v915_v15  ;;  %702 = vmatpush.msra.mxu3 %v915_v15 }
  0x2f   : > { %323 = vmatmul.f32.vlgmr.msra.gmra.mxu0 %v274_v16  ;;  %359 = vmatmul.f32.vlgmr.msra.gmra.mxu3 %v286_v17 }
  0x30   : > { %703 = vmatpush.msrb.mxu3 %v387_v29  ;;  %422 = vmatpush.msra.mxu1 %v373_v61 }
  0x32   : > { %704 = vmatpush.msrb.mxu3 %v386_v31  ;;  %423 = vmatpush.msra.mxu1 %v372_v63 }
  0x33   : > { %424 = vmatmul.f32.vlgmr.msra.gmra.mxu1 %v915_v15 }
  0x34   : > { %705 = vmatpush.msrb.mxu3 %v385_v33 }
  0x36   : > { %706 = vmatpush.msrb.mxu3 %v384_v35 }
  0x37   : > { %326 = vmatmul.f32.gmra.mxu0 %v275_v18  ;;  %362 = vmatmul.f32.gmra.mxu3 %v287_v19 }
  0x38   : > { %707 = vmatpush.msrb.mxu3 %v383_v38 }
  0x3a   : > { %708 = vmatpush.msrb.mxu3 %v382_v40 }
  0x3b   : > { %427 = vmatmul.f32.gmra.mxu1 %v904_v14 }
  0x3c   : > { %709 = vmatpush.msrb.mxu3 %v381_v42 }
  0x3e   : > { %710 = vmatpush.msrb.mxu3 %v380_v44 }
  0x3f   : > { %329 = vmatmul.f32.gmra.mxu0 %v276_v20  ;;  %365 = vmatmul.f32.gmra.mxu3 %v288_v21 }
  0x40   : > { %711 = vmatpush.msrb.mxu3 %v379_v47 }
  0x42   : > { %712 = vmatpush.msrb.mxu3 %v378_v49 }
  0x43   : > { %430 = vmatmul.f32.gmra.mxu1 %v899_v13 }
  0x44   : > { %713 = vmatpush.msrb.mxu3 %v377_v51 }
  0x46   : > { %714 = vmatpush.msrb.mxu3 %v376_v53 }
  0x47   : > { %332 = vmatmul.f32.gmra.mxu0 %v277_v22  ;;  %368 = vmatmul.f32.gmra.mxu3 %v289_v23 }
  0x48   : > { %715 = vmatpush.msrb.mxu3 %v375_v56 }
  0x4a   : > { %716 = vmatpush.msrb.mxu3 %v374_v58 }
  0x4b   : > { %433 = vmatmul.f32.gmra.mxu1 %v894_v12 }
  0x4c   : > { %717 = vmatpush.msrb.mxu3 %v373_v61 }
  0x4e   : > { %718 = vmatpush.msrb.mxu3 %v372_v63 }
  0x4f   : > { %335 = vmatmul.f32.gmra.mxu0 %v278_v24  ;;  %460 = vmatmul.f32.vlgmr.msrb.gmra.mxu3 %v849_v3 }
  0x50   : > { %719 = vmatpush.msra.mxu3 %v936_v28 }
  0x52   : > { %720 = vmatpush.msra.mxu3 %v944_v30 }
  0x53   : > { %436 = vmatmul.f32.gmra.mxu1 %v889_v11 }
  0x54   : > { %721 = vmatpush.msra.mxu3 %v953_v32 }
  0x56   : > { %722 = vmatpush.msra.mxu3 %v962_v34 }
  0x57   : > { %338 = vmatmul.f32.gmra.mxu0 %v279_v25  ;;  %463 = vmatmul.f32.gmra.mxu3 %v844_v2 }
  0x58   : > { %723 = vmatpush.msra.mxu3 %v972_v37 }
  0x5a   : > { %724 = vmatpush.msra.mxu3 %v981_v39 }
  0x5b   : > { %439 = vmatmul.f32.gmra.mxu1 %v884_v10 }
  0x5c   : > { %725 = vmatpush.msra.mxu3 %v990_v41 }
  0x5e   : > { %726 = vmatpush.msra.mxu3 %v999_v43 }
  0x5f   : > { %341 = vmatmul.f32.gmra.mxu0 %v280_v26  ;;  %466 = vmatmul.f32.gmra.mxu3 %v839_v1 }
  0x60   : > { %727 = vmatpush.msra.mxu3 %v395_v46 }
  0x62   : > { %728 = vmatpush.msra.mxu3 %v394_v48 }
  0x63   : > { %442 = vmatmul.f32.gmra.mxu1 %v879_v9 }
  0x64   : > { %729 = vmatpush.msra.mxu3 %v393_v50 }
  0x66   : > { %730 = vmatpush.msra.mxu3 %v392_v52 }
  0x67   : > { %344 = vmatmul.f32.gmra.mxu0 %v281_v27  ;;  %469 = vmatmul.f32.gmra.mxu3 %v836_v0 }
  0x68   : > { %731 = vmatpush.msra.mxu3 %v391_v55 }
  0x6a   : > { %732 = vmatpush.msra.mxu3 %v390_v57 }
  0x6b   : > { %445 = vmatmul.f32.gmra.mxu1 %v874_v8 }
  0x6c   : > { %733 = vmatpush.msra.mxu3 %v389_v59 }
  0x6e   : > { %734 = vmatpush.msra.mxu3 %v388_v62 }
  0x6f   : > { %347 = vmatmul.f32.gmra.mxu0 %v282_v36 }
  0x73   : > { %448 = vmatmul.f32.gmra.mxu1 %v869_v7 }
  0x77   : > { %350 = vmatmul.f32.gmra.mxu0 %v283_v45 }
  0x7b   : > { %451 = vmatmul.f32.gmra.mxu1 %v864_v6 }
  0x7f   : > { %353 = vmatmul.f32.gmra.mxu0 %v284_v54 }
  0x83   : > { %454 = vmatmul.f32.gmra.mxu1 %v859_v5  ;;  %v1084_v5 = vld [vmem:[%s1136_s3] ss:$0 sm:$0xff] }
  0x87   : > { %356 = vmatmul.f32.gmra.mxu0 %v285_v60 }
  0x8b   : > { %457 = vmatmul.f32.gmra.mxu1 %v854_v4 }
  0xac   : > { %v324_v2 = vpop.f32.mrf.mxu0 }
  0xad   : > { %489 = vmatmul.f32.vlgmr.msra.gmra.mxu2 %v324_v2 }
  0xb0   : > { %v425_v20 = vpop.f32.mrf.mxu1 }
  0xb1   : > { %v426_v24 = vadd.f32 %v1084_v5, %v425_v20 }
  0xb2   : > { %v360_v3 = vpop.f32.mrf.mxu3 }
  0xb3   : > { %525 = vmatmul.f32.vlgmr.msra.gmra.mxu3 %v360_v3 }
  0xb4   : > { %v327_v1 = vpop.f32.mrf.mxu0 }
  0xb5   : > { %492 = vmatmul.f32.gmra.mxu2 %v327_v1 }
  0xb8   : > { %v428_v21 = vpop.f32.mrf.mxu1 }
  0xb9   : > { %v429_v30 = vadd.f32 %v1084_v5, %v428_v21 }
  0xba   : > { %v363_v13 = vpop.f32.mrf.mxu3 }
  0xbb   : > { %528 = vmatmul.f32.gmra.mxu3 %v363_v13 }
  0xbc   : > { %v330_v14 = vpop.f32.mrf.mxu0 }
  0xbd   : > { %495 = vmatmul.f32.gmra.mxu2 %v330_v14 }
  0xc0   : > { %v431_v23 = vpop.f32.mrf.mxu1 }
  0xc1   : > { %v432_v39 = vadd.f32 %v1084_v5, %v431_v23 }
  0xc2   : > { %v366_v0 = vpop.f32.mrf.mxu3 }
  0xc3   : > { %531 = vmatmul.f32.gmra.mxu3 %v366_v0 }
  0xc4   : > { %v333_v12 = vpop.f32.mrf.mxu0 }
  0xc5   : > { %498 = vmatmul.f32.gmra.mxu2 %v333_v12 }
  0xc8   : > { %v434_v27 = vpop.f32.mrf.mxu1 }
  0xc9   : > { %v435_v47 = vadd.f32 %v1084_v5, %v434_v27 }
  0xca   : > { %v369_v15 = vpop.f32.mrf.mxu3 }
  0xcb   : > { %534 = vmatmul.f32.gmra.mxu3 %v369_v15 }
  0xcc   : > { %v336_v11 = vpop.f32.mrf.mxu0 }
  0xcd   : > { %501 = vmatmul.f32.gmra.mxu2 %v336_v11 }
  0xd0   : > { %v437_v38 = vpop.f32.mrf.mxu1 }
  0xd1   : > { %v438_v56 = vadd.f32 %v1084_v5, %v437_v38 }
  0xd2   : > { %v461_v19 = vpop.f32.mrf.mxu3 }
  0xd3   : > { %v462_v29 = vadd.f32 %v1084_v5, %v461_v19 }
  0xd4   : > { %v339_v16 = vpop.f32.mrf.mxu0 }
  0xd5   : > { %504 = vmatmul.f32.gmra.mxu2 %v339_v16 }
  0xd8   : > { %v440_v48 = vpop.f32.mrf.mxu1 }
  0xd9   : > { %v441_v2 = vadd.f32 %v1084_v5, %v440_v48 }
  0xda   : > { %v464_v6 = vpop.f32.mrf.mxu3 }
  0xdb   : > { %v465_v37 = vadd.f32 %v1084_v5, %v464_v6 }
  0xdc   : > { %v342_v10 = vpop.f32.mrf.mxu0 }
  0xdd   : > { %507 = vmatmul.f32.gmra.mxu2 %v342_v10 }
  0xe0   : > { %v443_v60 = vpop.f32.mrf.mxu1 }
  0xe1   : > { %v444_v0 = vadd.f32 %v1084_v5, %v443_v60 }
  0xe2   : > { %v467_v22 = vpop.f32.mrf.mxu3 }
  0xe3   : > { %v468_v46 = vadd.f32 %v1084_v5, %v467_v22 }
  0xe4   : > { %v345_v9 = vpop.f32.mrf.mxu0 }
  0xe5   : > { %510 = vmatmul.f32.gmra.mxu2 %v345_v9 }
  0xe8   : > { %v446_v13 = vpop.f32.mrf.mxu1 }
  0xe9   : > { %v447_v10 = vadd.f32 %v1084_v5, %v446_v13 }
  0xea   : > { %v470_v4 = vpop.f32.mrf.mxu3 }
  0xeb   : > { %v471_v55 = vadd.f32 %v1084_v5, %v470_v4 }
  0xec   : > { %v348_v17 = vpop.f32.mrf.mxu0 }
  0xed   : > { %513 = vmatmul.f32.gmra.mxu2 %v348_v17 }
  0xf0   : > { %v449_v16 = vpop.f32.mrf.mxu1 }
  0xf4   : > { %v351_v8 = vpop.f32.mrf.mxu0 }
  0xf5   : > { %516 = vmatmul.f32.gmra.mxu2 %v351_v8 }
  0xfc   : > { %v354_v18 = vpop.f32.mrf.mxu0 }
  0xfd   : > { %519 = vmatmul.f32.gmra.mxu2 %v354_v18  ;;  %v450_v18 = vadd.f32 %v1084_v5, %v449_v16 }
 0x104   : > { %v357_v7 = vpop.f32.mrf.mxu0 }
 0x105   : > { %522 = vmatmul.f32.gmra.mxu2 %v357_v7  ;;  %v452_v7 = vpop.f32.mrf.mxu1 }
 0x106   : > { %v453_v21 = vadd.f32 %v1084_v5, %v452_v7 }
 0x10d   : > { %v455_v23 = vpop.f32.mrf.mxu1 }
 0x130   : > { %v490_v25 = vpop.f32.mrf.mxu2 }
 0x131   : > { %v491_v26 = vadd.f32 %v490_v25, %v426_v24  ;;  %v456_v25 = vadd.f32 %v1084_v5, %v455_v23 }
 0x133   : > { %v538_v28 = vmax.f32 %v491_v26, 0.0 }
 0x135   : > { %554 = vst [vmem:[%s1091_s30] sm:$0xff] %v538_v28  ;;  %v458_v28 = vpop.f32.mrf.mxu1 }
 0x136   : > { %v526_v31 = vpop.f32.mrf.mxu3 }
 0x137   : > { %v527_v32 = vadd.f32 %v526_v31, %v462_v29 }
 0x138   : > { %v493_v33 = vpop.f32.mrf.mxu2 }
 0x139   : > { %v494_v34 = vadd.f32 %v493_v33, %v429_v30  ;;  %v550_v35 = vmax.f32 %v527_v32, 0.0  ;;  %v459_v30 = vadd.f32 %v1084_v5, %v458_v28 }
 0x13b   : > { %v539_v36 = vmax.f32 %v494_v34, 0.0  ;;  %566 = vst [vmem:[%s1091_s30 + $0x60] sm:$0xff] %v550_v35 }
 0x13d   : > { %555 = vst [vmem:[%s1091_s30 + $0x8] sm:$0xff] %v539_v36 }
 0x13e   : > { %v529_v40 = vpop.f32.mrf.mxu3 }
 0x13f   : > { %v530_v41 = vadd.f32 %v529_v40, %v465_v37 }
 0x140   : > { %v496_v42 = vpop.f32.mrf.mxu2 }
 0x141   : > { %v497_v43 = vadd.f32 %v496_v42, %v432_v39  ;;  %v551_v44 = vmax.f32 %v530_v41, 0.0 }
 0x143   : > { %v540_v45 = vmax.f32 %v497_v43, 0.0  ;;  %567 = vst [vmem:[%s1091_s30 + $0x68] sm:$0xff] %v551_v44 }
 0x145   : > { %556 = vst [vmem:[%s1091_s30 + $0x10] sm:$0xff] %v540_v45 }
 0x146   : > { %v532_v49 = vpop.f32.mrf.mxu3 }
 0x147   : > { %v533_v50 = vadd.f32 %v532_v49, %v468_v46 }
 0x148   : > { %v499_v51 = vpop.f32.mrf.mxu2 }
 0x149   : > { %v500_v52 = vadd.f32 %v499_v51, %v435_v47  ;;  %v552_v53 = vmax.f32 %v533_v50, 0.0 }
 0x14b   : > { %v541_v54 = vmax.f32 %v500_v52, 0.0  ;;  %568 = vst [vmem:[%s1091_s30 + $0x70] sm:$0xff] %v552_v53 }
 0x14d   : > { %557 = vst [vmem:[%s1091_s30 + $0x18] sm:$0xff] %v541_v54 }
 0x14e   : > { %v535_v57 = vpop.f32.mrf.mxu3 }
 0x14f   : > { %v536_v58 = vadd.f32 %v535_v57, %v471_v55 }
 0x150   : > { %v502_v59 = vpop.f32.mrf.mxu2 }
 0x151   : > { %v503_v61 = vadd.f32 %v502_v59, %v438_v56  ;;  %v553_v62 = vmax.f32 %v536_v58, 0.0 }
 0x153   : > { %v542_v63 = vmax.f32 %v503_v61, 0.0  ;;  %569 = vst [vmem:[%s1091_s30 + $0x78] sm:$0xff] %v553_v62 }
 0x155   : > { %558 = vst [vmem:[%s1091_s30 + $0x20] sm:$0xff] %v542_v63 }
 0x158   : > { %v505_v3 = vpop.f32.mrf.mxu2 }
 0x159   : > { %v506_v1 = vadd.f32 %v505_v3, %v441_v2 }
 0x15b   : > { %v543_v14 = vmax.f32 %v506_v1, 0.0 }
 0x15d   : > { %559 = vst [vmem:[%s1091_s30 + $0x28] sm:$0xff] %v543_v14 }
 0x160   : > { %v508_v12 = vpop.f32.mrf.mxu2 }
 0x161   : > { %v509_v15 = vadd.f32 %v508_v12, %v444_v0 }
 0x163   : > { %v544_v11 = vmax.f32 %v509_v15, 0.0 }
 0x165   : > { %560 = vst [vmem:[%s1091_s30 + $0x30] sm:$0xff] %v544_v11 }
 0x168   : > { %v511_v9 = vpop.f32.mrf.mxu2 }
 0x169   : > { %v512_v17 = vadd.f32 %v511_v9, %v447_v10 }
 0x16b   : > { %v545_v8 = vmax.f32 %v512_v17, 0.0 }
 0x16d   : > { %561 = vst [vmem:[%s1091_s30 + $0x38] sm:$0xff] %v545_v8 }
 0x170   : > { %v514_v19 = vpop.f32.mrf.mxu2 }
 0x171   : > { %v515_v20 = vadd.f32 %v514_v19, %v450_v18 }
 0x173   : > { %v546_v6 = vmax.f32 %v515_v20, 0.0 }
 0x175   : > { %562 = vst [vmem:[%s1091_s30 + $0x40] sm:$0xff] %v546_v6 }
 0x178   : > { %v517_v22 = vpop.f32.mrf.mxu2 }
 0x179   : > { %v518_v4 = vadd.f32 %v517_v22, %v453_v21 }
 0x17b   : > { %v547_v24 = vmax.f32 %v518_v4, 0.0 }
 0x17d   : > { %563 = vst [vmem:[%s1091_s30 + $0x48] sm:$0xff] %v547_v24 }
 0x180   : > { %v520_v26 = vpop.f32.mrf.mxu2 }
 0x181   : > { %v521_v27 = vadd.f32 %v520_v26, %v456_v25 }
 0x183   : > { %v548_v29 = vmax.f32 %v521_v27, 0.0 }
 0x185   : > { %564 = vst [vmem:[%s1091_s30 + $0x50] sm:$0xff] %v548_v29 }
 0x188   : > { %v523_v31 = vpop.f32.mrf.mxu2 }
 0x189   : > { %v524_v32 = vadd.f32 %v523_v31, %v459_v30 }
 0x18b   : > { %v549_v33 = vmax.f32 %v524_v32, 0.0 }
 0x18d   : > { %565 = vst [vmem:[%s1091_s30 + $0x58] sm:$0xff] %v549_v33 }
 0x18e PF: > { %s14_s17 = sadd.s32 1, %s782_s17   ;;  %s1138_s15 = smov %s778_s16 }
 0x18f   : > { %p11_p5 = scmp.ge.s32.totalorder %s14_s17, 4   ;;  %s1139_s16 = smov %s1141_s18 }
 0x191   :  { %13 = sbr.rel (!%p11_p5) target bundleno = 2 (0x2), region = 70 }

</bundles_post_ra>
